<compile_context>
chip_gen: v7x
topology: tpu7x:2x2x1
jax: 0.10.0
libtpu: 0.0.40
codegen_flags: <defaults>
</compile_context>

<pallas_src>
import functools

import jax
import jax.numpy as jnp
from jax.experimental import pallas as pl
from jax.experimental.pallas import tpu as pltpu


def _round_up(x, m):
    return ((x + m - 1) // m) * m


def _proj_kernel(x_ref, w_ref, b_ref, o_ref):
    # One grid step: a (tm, K) bf16 slab of patches against the resident
    # (K, E) bf16 projection matrix. f32 accumulation on the MXU, bias added
    # in f32, stored as f32 with a lane-dense (multiple-of-128) last dim.
    acc = jnp.dot(x_ref[...], w_ref[...], preferred_element_type=jnp.float32)
    o_ref[...] = (acc + b_ref[...]).astype(o_ref.dtype)


def tubelet_projection(patches, w, b, *, tm=512):
    """patches: (M, K) bf16, w: (K, E) bf16, b: (1, E) f32 -> (M, E) f32.

    Requires M % 8 == 0 and E % 128 == 0 (caller pads). M need not be a
    multiple of tm: the grid uses cdiv and Pallas masks the ragged edge block.
    """
    M, K = patches.shape
    _, E = w.shape
    assert M % 8 == 0, "pad M to a multiple of 8 (sublane) in the caller"
    assert E % 128 == 0, "pad E to a multiple of 128 (lane-dense) in the caller"

    # Largest row tile <= requested, multiple of 8, no larger than M.
    tm = max(8, min(tm, M))
    tm = (tm // 8) * 8
    grid_m = pl.cdiv(M, tm)

    # VMEM budget: double-buffered X and out tiles + (resident, double-buffered
    # by Pallas) W and bias. Cap at 48 MiB so v7x's 64 MiB per-TC VMEM is safe.
    bytes_x = 2 * tm * K * patches.dtype.itemsize
    bytes_o = 2 * tm * E * 4
    bytes_w = 2 * K * E * w.dtype.itemsize + 2 * E * 4
    vmem_needed = bytes_x + bytes_o + bytes_w
    vmem_limit = int(min(48 * 2**20, max(2 * vmem_needed, 16 * 2**20)))

    cost = pl.CostEstimate(
        flops=2 * M * K * E,
        transcendentals=0,
        bytes_accessed=(M * K * patches.dtype.itemsize
                        + K * E * w.dtype.itemsize
                        + M * E * 4 + E * 4),
    )

    return pl.pallas_call(
        _proj_kernel,
        out_shape=jax.ShapeDtypeStruct((M, E), jnp.float32),
        grid_spec=pltpu.PrefetchScalarGridSpec(
            num_scalar_prefetch=0,
            grid=(grid_m,),
            in_specs=[
                pl.BlockSpec((tm, K), lambda i: (i, 0)),   # X slab
                pl.BlockSpec((K, E), lambda i: (0, 0)),    # resident W
                pl.BlockSpec((1, E), lambda i: (0, 0)),    # resident bias
            ],
            out_specs=pl.BlockSpec((tm, E), lambda i: (i, 0)),
        ),
        compiler_params=pltpu.CompilerParams(
            dimension_semantics=("parallel",),
            vmem_limit_bytes=vmem_limit,
        ),
        cost_estimate=cost,
    )(patches, w, b)


def tubelet_embeddings(pixel_values, conv_w, conv_b, patch_size, *, tm=512):
    """
    pixel_values: (B, C, T, H, W)  -- NCDHW, like the PyTorch module.
    conv_w: (E, C, pt, ph, pw), conv_b: (E,)
    returns (B, num_patches, E), patches ordered (t, h, w) -- matches
    Conv3d(...).flatten(2).transpose(1, 2).
    """
    B, C, T, H, W = pixel_values.shape
    pt, ph, pw = patch_size
    E = conv_w.shape[0]
    nt, nh, nw = T // pt, H // ph, W // pw
    num_patches = nt * nh * nw
    K = C * pt * ph * pw

    # --- glue: non-overlapping tubelet extraction (reshape/transpose) ---
    # TODO(synk): this transpose is still a separate HBM-bound XLA op; fully
    # fusing it into the pallas_call (grid over (B, nt), flatten in-kernel)
    # needs rank-6 in-kernel transposes that Mosaic does not lower robustly.
    x = pixel_values.reshape(B, C, nt, pt, nh, ph, nw, pw)
    # -> (B, nt, nh, nw, C, pt, ph, pw): row order (b, t, h, w); inner order
    # (c, dt, dh, dw) matches the conv weight's reduction order.
    x = x.transpose(0, 2, 4, 6, 1, 3, 5, 7)
    # Cast to bf16 here so XLA fuses the convert into the transpose copy:
    # halves the transpose's write bytes and the kernel's X read stream.
    patches = x.reshape(B * num_patches, K).astype(jnp.bfloat16)

    M = B * num_patches
    M_pad = _round_up(M, 8)
    if M_pad != M:
        patches = jnp.pad(patches, ((0, M_pad - M), (0, 0)))

    # Pad E to a lane-dense multiple of 128 so output stores are unmasked.
    E_pad = _round_up(E, 128)
    w2d = conv_w.reshape(E, K).T.astype(jnp.bfloat16)   # (K, E)
    b2d = conv_b.reshape(1, E).astype(jnp.float32)
    if E_pad != E:
        w2d = jnp.pad(w2d, ((0, 0), (0, E_pad - E)))
        b2d = jnp.pad(b2d, ((0, 0), (0, E_pad - E)))

    out = tubelet_projection(patches, w2d, b2d, tm=tm)  # (M_pad, E_pad) f32
    out = out[:M, :E]
    return out.reshape(B, num_patches, E)


if __name__ == "__main__":
    # Small config consistent with the module's __init__:
    # video_size = (T, H, W), patch_size = (pt, ph, pw)
    video_size = (8, 16, 16)
    patch_size = (2, 4, 4)
    num_channels = 4
    embed_dim = 32
    batch = 2

    key = jax.random.PRNGKey(0)
    k_x, k_w, k_b = jax.random.split(key, 3)

    T, H, W = video_size
    pt, ph, pw = patch_size
    pixel_values = jax.random.normal(
        k_x, (batch, num_channels, T, H, W), dtype=jnp.float32)
    conv_w = 0.02 * jax.random.normal(
        k_w, (embed_dim, num_channels, pt, ph, pw), dtype=jnp.float32)
    conv_b = 0.01 * jax.random.normal(k_b, (embed_dim,), dtype=jnp.float32)

    fwd = jax.jit(functools.partial(tubelet_embeddings, patch_size=patch_size))
    out = jax.block_until_ready(fwd(pixel_values, conv_w, conv_b))

    # Reference check with plain JAX f32 conv (NCDHW, OIDHW), stride == kernel.
    # Tolerance loosened because kernel operands are bf16 (f32 accumulation).
    ref = jax.lax.conv_general_dilated(
        pixel_values, conv_w, window_strides=patch_size, padding="VALID",
        dimension_numbers=("NCDHW", "OIDHW", "NCDHW"))
    ref = ref + conv_b.reshape(1, embed_dim, 1, 1, 1)
    ref = ref.reshape(batch, embed_dim, -1).transpose(0, 2, 1)  # (B, P, E)

    nt, nh, nw = T // pt, H // ph, W // pw
    assert out.shape == (batch, nt * nh * nw, embed_dim), out.shape
    assert jnp.allclose(out, ref, atol=3e-2, rtol=3e-2), "mismatch vs reference"

    print("KERNEL_OK")
</pallas_src>

<mosaic_0001>
module attributes {stable_mosaic.version = 11 : i64} {
  func.func @_proj_kernel(%arg0: i32, %arg1: memref<128x128xbf16, #tpu.memory_space<vmem>>, %arg2: memref<128x128xbf16, #tpu.memory_space<vmem>>, %arg3: memref<1x128xf32, #tpu.memory_space<vmem>>, %arg4: memref<128x128xf32, #tpu.memory_space<vmem>>) attributes {dimension_semantics = [#tpu.dimension_semantics<parallel>], iteration_bounds = array<i64: 1>, scalar_prefetch = 0 : i64, scratch_operands = 0 : i64, tpu.core_type = #tpu.core_type<tc>, window_params = [{transform_indices = @transform_0, window_bounds = array<i64: 128, 128>}, {pipeline_mode = #tpu.pipeline_mode<synchronous>, transform_indices = @transform_1, window_bounds = array<i64: 128, 128>}, {pipeline_mode = #tpu.pipeline_mode<synchronous>, transform_indices = @transform_2, window_bounds = array<i64: 1, 128>}, {transform_indices = @transform_3, window_bounds = array<i64: 128, 128>}]} {
    %c0 = arith.constant 0 : index
    %c0_0 = arith.constant 0 : index
    %0 = vector.load %arg1[%c0, %c0_0] : memref<128x128xbf16, #tpu.memory_space<vmem>>, vector<128x128xbf16>
    %c0_1 = arith.constant 0 : index
    %c0_2 = arith.constant 0 : index
    %1 = vector.load %arg2[%c0_1, %c0_2] : memref<128x128xbf16, #tpu.memory_space<vmem>>, vector<128x128xbf16>
    %cst = arith.constant dense<0.000000e+00> : vector<128x128xf32>
    %2 = tpu.matmul %0, %1, %cst {dimension_numbers = #tpu.dot_dimension_numbers<[1], [0], [0], [1], [0, 0, 1, 1], [], []>} : vector<128x128xbf16>, vector<128x128xbf16>, vector<128x128xf32> -> vector<128x128xf32>
    %c0_3 = arith.constant 0 : index
    %c0_4 = arith.constant 0 : index
    %3 = vector.load %arg3[%c0_3, %c0_4] : memref<1x128xf32, #tpu.memory_space<vmem>>, vector<1x128xf32>
    %4 = vector.broadcast %3 : vector<1x128xf32> to vector<128x128xf32>
    %5 = arith.addf %2, %4 : vector<128x128xf32>
    %c0_5 = arith.constant 0 : index
    %c0_6 = arith.constant 0 : index
    %6 = vector.load %arg4[%c0_5, %c0_6] : memref<128x128xf32, #tpu.memory_space<vmem>>, vector<128x128xf32>
    tpu.vector_store %arg4[%c0_5, %c0_6], %5 {strides = array<i32>} : memref<128x128xf32, #tpu.memory_space<vmem>>, vector<128x128xf32>,
    return
  }
  func.func @transform_0(%arg0: i32) -> (i32, i32) {
    %c0_i32 = arith.constant 0 : i32
    %c0_i32_0 = arith.constant 0 : i32
    return %arg0, %c0_i32 : i32, i32
  }
  func.func @transform_1(%arg0: i32) -> (i32, i32) {
    %c0_i32 = arith.constant 0 : i32
    %c0_i32_0 = arith.constant 0 : i32
    %c0_i32_1 = arith.constant 0 : i32
    return %c0_i32, %c0_i32_0 : i32, i32
  }
  func.func @transform_2(%arg0: i32) -> (i32, i32) {
    %c0_i32 = arith.constant 0 : i32
    %c0_i32_0 = arith.constant 0 : i32
    %c0_i32_1 = arith.constant 0 : i32
    return %c0_i32, %c0_i32_0 : i32, i32
  }
  func.func @transform_3(%arg0: i32) -> (i32, i32) {
    %c0_i32 = arith.constant 0 : i32
    %c0_i32_0 = arith.constant 0 : i32
    return %arg0, %c0_i32 : i32, i32
  }
}

</mosaic_0001>

<bundles_post_ra>
// kernel: tubelet_embeddings.1
= control target key start
LH: loop header
LB: loop body
LE: loop exit
PB: predicated region body
PF: predicated region fallthrough
CT: control target
= control target key end

     0   :  { %s483_s1 = inlined_call_operand.vmem [shape: bf16[128,128], index: 1, kind: input, shape index: {}]   ;;  %s484_s0 = inlined_call_operand.vmem [shape: bf16[128,128], index: 0, kind: input, shape index: {}]   ;;  %s485_s2 = inlined_call_operand.vmem [shape: f32[1,128], index: 2, kind: input, shape index: {}]   ;;  %s486_s3 = inlined_call_operand.vmem [shape: f32[128,128], index: 3, kind: output, shape index: {}]  }
   0x1   :  { %v348_v0 = vld [vmem:[%s483_s1] sm:$0xff]   ;;  %v349_v1 = vld [vmem:[%s483_s1 + $0x8] sm:$0xff]   ;;  %v350_v2 = vld [vmem:[%s483_s1 + $0x10] sm:$0xff]  }
   0x2   :  { %300 = vmatprep.subr.bf16.mxu0 %v348_v0  ;;  %332 = vmatprep.subr.bf16.mxu1 %v348_v0  ;;  %v351_v3 = vld [vmem:[%s483_s1 + $0x18] sm:$0xff]   ;;  %v356_v4 = vld [vmem:[%s484_s0] sm:$0xff]   ;;  %v353_v7 = vld [vmem:[%s483_s1 + $0x28] sm:$0xff]  }
   0x3   :  { %301 = vmatpush3.bf16.msra.mxu0 %v348_v0  ;;  %340 = vmatpush3.bf16.msra.mxu1 %v348_v0  ;;  %v357_v5 = vld [vmem:[%s484_s0 + $0x20] sm:$0xff]   ;;  %v354_v8 = vld [vmem:[%s483_s1 + $0x30] sm:$0xff]   ;;  %v355_v9 = vld [vmem:[%s483_s1 + $0x38] sm:$0xff]  }
   0x4   :  { %302 = vmatprep.subr.bf16.mxu0 %v349_v1  ;;  %333 = vmatprep.subr.bf16.mxu1 %v349_v1  ;;  %v352_v6 = vld [vmem:[%s483_s1 + $0x20] sm:$0xff]   ;;  %v358_v10 = vld [vmem:[%s484_s0 + $0x8] sm:$0xff]   ;;  %v360_v12 = vld [vmem:[%s484_s0 + $0x10] sm:$0xff]  }
   0x5   :  { %316 = vmatprep.mubr.bf16.mxu0 %v356_v4  ;;  %324 = vmatprep.mubr.bf16.mxu1 %v357_v5  ;;  %v359_v11 = vld [vmem:[%s484_s0 + $0x28] sm:$0xff]   ;;  %v361_v13 = vld [vmem:[%s484_s0 + $0x30] sm:$0xff]   ;;  %v362_v14 = vld [vmem:[%s484_s0 + $0x18] sm:$0xff]  }
   0x6   :  { %v363_v15 = vld [vmem:[%s484_s0 + $0x38] sm:$0xff]   ;;  %v267_v16 = vld [vmem:[%s485_s2] ss:$0 sm:$0xff] }
   0x7   :  { %303 = vmatpush3.bf16.msra.mxu0 %v349_v1  ;;  %341 = vmatpush3.bf16.msra.mxu1 %v349_v1 }
   0x8   :  { %304 = vmatprep.subr.bf16.mxu0 %v350_v2  ;;  %334 = vmatprep.subr.bf16.mxu1 %v350_v2 }
   0xb   :  { %305 = vmatpush3.bf16.msra.mxu0 %v350_v2  ;;  %342 = vmatpush3.bf16.msra.mxu1 %v350_v2 }
   0xc   :  { %306 = vmatprep.subr.bf16.mxu0 %v351_v3  ;;  %335 = vmatprep.subr.bf16.mxu1 %v351_v3 }
   0xf   :  { %307 = vmatpush3.bf16.msra.mxu0 %v351_v3  ;;  %343 = vmatpush3.bf16.msra.mxu1 %v351_v3 }
  0x10   :  { %308 = vmatprep.subr.bf16.mxu0 %v352_v6  ;;  %336 = vmatprep.subr.bf16.mxu1 %v352_v6 }
  0x13   :  { %309 = vmatpush3.bf16.msra.mxu0 %v352_v6  ;;  %344 = vmatpush3.bf16.msra.mxu1 %v352_v6 }
  0x14   :  { %310 = vmatprep.subr.bf16.mxu0 %v353_v7  ;;  %337 = vmatprep.subr.bf16.mxu1 %v353_v7 }
  0x17   :  { %311 = vmatpush3.bf16.msra.mxu0 %v353_v7  ;;  %345 = vmatpush3.bf16.msra.mxu1 %v353_v7 }
  0x18   :  { %312 = vmatprep.subr.bf16.mxu0 %v354_v8  ;;  %338 = vmatprep.subr.bf16.mxu1 %v354_v8 }
  0x1b   :  { %313 = vmatpush3.bf16.msra.mxu0 %v354_v8  ;;  %346 = vmatpush3.bf16.msra.mxu1 %v354_v8 }
  0x1c   :  { %314 = vmatprep.subr.bf16.mxu0 %v355_v9  ;;  %339 = vmatprep.subr.bf16.mxu1 %v355_v9 }
  0x1f   :  { %315 = vmatpush3.bf16.msra.mxu0 %v355_v9  ;;  %347 = vmatpush3.bf16.msra.mxu1 %v355_v9 }
  0x22   :  { %317 = vmatmul.mubr.bf16.vlgmr.msra.gmra.mrb[0].mxu0 %v358_v10  ;;  %325 = vmatmul.mubr.bf16.vlgmr.msra.gmra.mrb[0].mxu1 %v359_v11 }
  0x23   :  { %320 = vmatprep.mubr.bf16.mxu0 %v360_v12  ;;  %328 = vmatprep.mubr.bf16.mxu1 %v361_v13 }
  0x2a   :  { %321 = vmatmul.mubr.bf16.gmra.mrb[4].mxu0 %v362_v14  ;;  %329 = vmatmul.mubr.bf16.gmra.mrb[4].mxu1 %v363_v15 }
  0xf5   :  { %v318_v17 = vpop.f32.mrb[0].mxu0  ;;  %v326_v18 = vpop.f32.mrb[0].mxu1 }
  0xf6   :  { %v193_v19 = vadd.f32 %v318_v17, %v267_v16  ;;  %v225_v20 = vadd.f32 %v326_v18, %v267_v16  ;;  %v184_v21 = vpop.f32.mrb[1].mxu0  ;;  %v216_v22 = vpop.f32.mrb[1].mxu1 }
  0xf7   :  { %v185_v23 = vadd.f32 %v267_v16, %v184_v21  ;;  %v217_v24 = vadd.f32 %v267_v16, %v216_v22  ;;  %v319_v25 = vpop.f32.mrb[2].mxu0  ;;  %v327_v26 = vpop.f32.mrb[2].mxu1 }
  0xf8   :  { %249 = vst [vmem:[%s486_s3 + $0x10] sm:$0xff] %v193_v19  ;;  %257 = vst [vmem:[%s486_s3 + $0x50] sm:$0xff] %v225_v20  ;;  %v196_v27 = vadd.f32 %v319_v25, %v267_v16  ;;  %v228_v28 = vadd.f32 %v327_v26, %v267_v16  ;;  %v187_v29 = vpop.f32.mrb[3].mxu0  ;;  %v219_v30 = vpop.f32.mrb[3].mxu1 }
  0xf9   :  { %247 = vst [vmem:[%s486_s3] sm:$0xff] %v185_v23  ;;  %255 = vst [vmem:[%s486_s3 + $0x40] sm:$0xff] %v217_v24  ;;  %v188_v31 = vadd.f32 %v267_v16, %v187_v29  ;;  %v220_v32 = vadd.f32 %v267_v16, %v219_v30 }
  0xfa   :  { %250 = vst [vmem:[%s486_s3 + $0x18] sm:$0xff] %v196_v27  ;;  %258 = vst [vmem:[%s486_s3 + $0x58] sm:$0xff] %v228_v28 }
  0xfb   :  { %248 = vst [vmem:[%s486_s3 + $0x8] sm:$0xff] %v188_v31  ;;  %256 = vst [vmem:[%s486_s3 + $0x48] sm:$0xff] %v220_v32 }
  0xfd   :  { %v322_v33 = vpop.f32.mrb[4].mxu0  ;;  %v330_v34 = vpop.f32.mrb[4].mxu1 }
  0xfe   :  { %v209_v35 = vadd.f32 %v322_v33, %v267_v16  ;;  %v241_v36 = vadd.f32 %v330_v34, %v267_v16  ;;  %v200_v37 = vpop.f32.mrb[5].mxu0  ;;  %v232_v38 = vpop.f32.mrb[5].mxu1 }
  0xff   :  { %v201_v39 = vadd.f32 %v267_v16, %v200_v37  ;;  %v233_v40 = vadd.f32 %v267_v16, %v232_v38  ;;  %v323_v41 = vpop.f32.mrb[6].mxu0  ;;  %v331_v42 = vpop.f32.mrb[6].mxu1 }
 0x100   :  { %253 = vst [vmem:[%s486_s3 + $0x30] sm:$0xff] %v209_v35  ;;  %261 = vst [vmem:[%s486_s3 + $0x70] sm:$0xff] %v241_v36  ;;  %v212_v43 = vadd.f32 %v323_v41, %v267_v16  ;;  %v244_v44 = vadd.f32 %v331_v42, %v267_v16  ;;  %v203_v45 = vpop.f32.mrb[7].mxu0  ;;  %v235_v46 = vpop.f32.mrb[7].mxu1 }
 0x101   :  { %251 = vst [vmem:[%s486_s3 + $0x20] sm:$0xff] %v201_v39  ;;  %259 = vst [vmem:[%s486_s3 + $0x60] sm:$0xff] %v233_v40  ;;  %v204_v47 = vadd.f32 %v267_v16, %v203_v45  ;;  %v236_v48 = vadd.f32 %v267_v16, %v235_v46 }
 0x102   :  { %254 = vst [vmem:[%s486_s3 + $0x38] sm:$0xff] %v212_v43  ;;  %262 = vst [vmem:[%s486_s3 + $0x78] sm:$0xff] %v244_v44 }
 0x103   :  { %252 = vst [vmem:[%s486_s3 + $0x28] sm:$0xff] %v204_v47  ;;  %260 = vst [vmem:[%s486_s3 + $0x68] sm:$0xff] %v236_v48 }

</bundles_post_ra>
